<compile_context>
chip_gen: v7x
topology: tpu7x:2x2x1
jax: 0.10.0
libtpu: 0.0.40
codegen_flags: <defaults>
</compile_context>

<pallas_src>
import jax
import jax.numpy as jnp
from jax import lax
from jax.experimental import pallas as pl
from jax.experimental.pallas import tpu as pltpu

KSIZE = 7          # SAM conv kernel size
PAD = KSIZE // 2   # 'same' padding = 3


def _cbam_kernel(x_ref, w1_ref, b1_ref, w2_ref, b2_ref, tmax_ref, tavg_ref, o_ref):
    """x_ref/o_ref: (tb, C, H*W) lane-dense blocks.
    w1_ref: (Cr, C)   first Linear weight (torch layout)
    b1_ref: (1, Cr)   first Linear bias
    w2_ref: (C, Cr)   second Linear weight (torch layout)
    b2_ref: (1, C)    second Linear bias
    tmax_ref/tavg_ref: (HW, HW) banded matrices encoding the 7x7 'same' conv taps
                       acting on the channel-max / channel-avg map respectively.
    """
    tb, C, HW = x_ref.shape
    inv_hw = 1.0 / HW
    inv_c = 1.0 / C

    x = x_ref[...]                                        # (tb, C, HW)
    w1 = w1_ref[...]                                      # (Cr, C)
    b1 = b1_ref[...]                                      # (1, Cr)
    w2 = w2_ref[...]                                      # (C, Cr)
    b2 = b2_ref[...]                                      # (1, C)

    # ---------------- CAM: channel attention (batched over tb) ----------------
    mx = jnp.max(x, axis=2)                               # (tb, C)
    av = jnp.sum(x, axis=2) * inv_hw                      # (tb, C)

    def mlp(v):                                           # (tb, C) -> (tb, C), bias-free output
        h = jnp.sum(v[:, None, :] * w1[None, :, :], axis=2) + b1     # (tb, Cr)
        h = jnp.maximum(h, 0.0)                                       # ReLU
        return jnp.sum(h[:, None, :] * w2[None, :, :], axis=2)       # (tb, C)

    # b2 is added once per MLP evaluation in the reference module -> 2*b2 total.
    att_c = jax.nn.sigmoid(mlp(mx) + mlp(av) + 2.0 * b2)  # (tb, C)
    x_cam = x * att_c[:, :, None]                         # (tb, C, HW)

    # ---------------- SAM: spatial attention (one batched MXU pass) -----------
    ch_max = jnp.max(x_cam, axis=1)                       # (tb, HW)
    ch_avg = jnp.sum(x_cam, axis=1) * inv_c               # (tb, HW)
    # 7x7 'same' conv over [max, avg] as two matmuls sharing one accumulator
    # (no lane concat; T halves stream from VMEM straight into the MXU).
    s = (jnp.dot(ch_max, tmax_ref[...], preferred_element_type=jnp.float32)
         + jnp.dot(ch_avg, tavg_ref[...], preferred_element_type=jnp.float32))   # (tb, HW)
    att_s = jax.nn.sigmoid(s)                             # (tb, HW)

    # Output: spatial attention applied to the channel-attended tensor.
    o_ref[...] = (x_cam * att_s[:, None, :]).astype(o_ref.dtype)


def _build_sam_band_matrices(conv_w, H, W):
    """Turn the (2, 7, 7) SAM conv weight into two banded (H*W, H*W) matrices
    (T_max, T_avg) such that conv2d_same([max, avg]) flattened ==
    max_flat @ T_max + avg_flat @ T_avg.  Zero padding is implicit in the band."""
    dh = jnp.arange(H)[:, None] - jnp.arange(H)[None, :] + PAD    # (H, H) [src_row, out_row]
    dw = jnp.arange(W)[:, None] - jnp.arange(W)[None, :] + PAD    # (W, W) [src_col, out_col]
    vh = (dh >= 0) & (dh < KSIZE)
    vw = (dw >= 0) & (dw < KSIZE)
    dhc = jnp.clip(dh, 0, KSIZE - 1)
    dwc = jnp.clip(dw, 0, KSIZE - 1)
    mask = vh[:, None, :, None] & vw[None, :, None, :]            # (H, W, H, W)

    def band(wk):                                                 # wk: (7, 7)
        tt = wk[dhc[:, None, :, None], dwc[None, :, None, :]]     # (H, W, H, W)
        return jnp.where(mask, tt, 0.0).reshape(H * W, H * W)

    return band(conv_w[0]), band(conv_w[1])


def _pick_tb(B, C, HW, itemsize):
    """Images per grid step: aim for >=512 KiB x-blocks (HBM-roofline regime),
    keep >=2 grid steps (v7x megacore) only once the block is already big."""
    per_image = max(1, C * HW * itemsize)
    target = 512 * 1024
    cap = 8 * 1024 * 1024          # keep double-buffered in+out comfortably in VMEM
    best = 1
    for d in range(1, B + 1):
        if B % d:
            continue
        if d * per_image <= cap:
            best = d
        if d * per_image >= target and B // d >= 2:
            return d
    return best


def cbam_forward(x, w1, b1, w2, b2, conv_w, tb=None):
    """CBAM forward.
    x:      (B, C, H, W) float32
    w1:     (C//r, C)  first Linear weight (torch layout),  b1: (C//r,)
    w2:     (C, C//r)  second Linear weight (torch layout), b2: (C,)
    conv_w: (2, 7, 7)  SAM conv weight; input channel 0 -> max map, channel 1 -> avg map.
    """
    B, C, H, W = x.shape
    Cr = w1.shape[0]
    HW = H * W
    # TODO(synk): if H*W is not a multiple of 128, pad the spatial plane in the
    # wrapper so output stores stay dense (perf cliff otherwise, not correctness).

    if tb is None:
        tb = _pick_tb(B, C, HW, x.dtype.itemsize)
    assert B % tb == 0, "tb must divide the batch size"

    f32 = jnp.float32
    x_flat = x.reshape(B, C, HW)
    w1_m = jnp.asarray(w1, f32)                   # (Cr, C)
    b1_row = jnp.asarray(b1, f32).reshape(1, Cr)  # (1, Cr)
    w2_m = jnp.asarray(w2, f32)                   # (C, Cr)
    b2_row = jnp.asarray(b2, f32).reshape(1, C)   # (1, C)
    t_max, t_avg = _build_sam_band_matrices(jnp.asarray(conv_w, f32), H, W)  # 2 x (HW, HW)

    # Explicit VMEM budget: in/out double-buffered + (double-buffered) constants + slack.
    block_bytes = tb * C * HW * x.dtype.itemsize
    const_bytes = 4 * (w1_m.size + b1_row.size + w2_m.size + b2_row.size
                       + t_max.size + t_avg.size)
    vmem_limit = int(min(max(4 * block_bytes + 2 * const_bytes + (1 << 20), 32 << 20),
                         64 << 20))

    out_flat = pl.pallas_call(
        _cbam_kernel,
        out_shape=jax.ShapeDtypeStruct((B, C, HW), x.dtype),
        grid=(B // tb,),
        in_specs=[
            pl.BlockSpec((tb, C, HW), lambda i: (i, 0, 0)),   # x (lane-dense)
            pl.BlockSpec((Cr, C), lambda i: (0, 0)),          # w1
            pl.BlockSpec((1, Cr), lambda i: (0, 0)),          # b1
            pl.BlockSpec((C, Cr), lambda i: (0, 0)),          # w2
            pl.BlockSpec((1, C), lambda i: (0, 0)),           # b2
            pl.BlockSpec((HW, HW), lambda i: (0, 0)),         # T (max map)
            pl.BlockSpec((HW, HW), lambda i: (0, 0)),         # T (avg map)
        ],
        out_specs=pl.BlockSpec((tb, C, HW), lambda i: (i, 0, 0)),
        compiler_params=pltpu.CompilerParams(
            dimension_semantics=("parallel",),                # batch steps independent
            vmem_limit_bytes=vmem_limit),
    )(x_flat, w1_m, b1_row, w2_m, b2_row, t_max, t_avg)

    return out_flat.reshape(B, C, H, W)


def cbam_reference(x, w1, b1, w2, b2, conv_w):
    """Pure-JAX reference matching the PyTorch module semantics."""
    hi = lax.Precision.HIGHEST
    mx = jnp.max(x, axis=(2, 3))                   # (B, C)
    av = jnp.mean(x, axis=(2, 3))                  # (B, C)

    def mlp(v):
        h = jax.nn.relu(jnp.dot(v, w1.T, precision=hi) + b1)   # (B, Cr)
        return jnp.dot(h, w2.T, precision=hi) + b2             # (B, C)

    att_c = jax.nn.sigmoid(mlp(mx) + mlp(av))[:, :, None, None]
    x_cam = x * att_c
    mc = jnp.max(x_cam, axis=1, keepdims=True)
    ac = jnp.mean(x_cam, axis=1, keepdims=True)
    cat = jnp.concatenate([mc, ac], axis=1)        # (B, 2, H, W)
    s = lax.conv_general_dilated(cat, conv_w[None], (1, 1),
                                 [(PAD, PAD), (PAD, PAD)],
                                 dimension_numbers=("NCHW", "OIHW", "NCHW"),
                                 precision=hi)
    return jax.nn.sigmoid(s) * x_cam


if __name__ == "__main__":
    B, C, H, W, r = 2, 8, 16, 16, 4
    Cr = C // r

    key = jax.random.PRNGKey(0)
    k1, k2, k3, k4, k5, k6 = jax.random.split(key, 6)

    x = jax.random.normal(k1, (B, C, H, W), jnp.float32)
    # synthetic parameters in native torch layouts (shapes follow nn.Module __init__)
    w1 = jax.random.normal(k2, (Cr, C), jnp.float32) * 0.3          # Linear(C -> Cr) weight
    b1 = jax.random.normal(k3, (Cr,), jnp.float32) * 0.1            # Linear(C -> Cr) bias
    w2 = jax.random.normal(k4, (C, Cr), jnp.float32) * 0.3          # Linear(Cr -> C) weight
    b2 = jax.random.normal(k5, (C,), jnp.float32) * 0.1             # Linear(Cr -> C) bias
    conv_w = jax.random.normal(k6, (2, KSIZE, KSIZE), jnp.float32) * 0.1  # SAM conv (in=2)

    out = jax.block_until_ready(cbam_forward(x, w1, b1, w2, b2, conv_w))
    ref = jax.block_until_ready(cbam_reference(x, w1, b1, w2, b2, conv_w))

    max_err = float(jnp.max(jnp.abs(out - ref)))
    # Loose-ish tolerance accommodates MXU matmul input-precision differences between
    # the in-kernel conv-as-matmul and the HIGHEST-precision XLA reference conv;
    # logic errors would be orders of magnitude larger.
    if max_err > 2e-2:
        raise AssertionError(f"Pallas CBAM mismatch vs reference: max abs err {max_err}")

    print("KERNEL_OK")
</pallas_src>

<mosaic_0001>
module attributes {stable_mosaic.version = 11 : i64} {
  func.func @_cbam_kernel(%arg0: i32, %arg1: memref<2x8x256xf32, #tpu.memory_space<vmem>>, %arg2: memref<2x8xf32, #tpu.memory_space<vmem>>, %arg3: memref<1x2xf32, #tpu.memory_space<vmem>>, %arg4: memref<8x2xf32, #tpu.memory_space<vmem>>, %arg5: memref<1x8xf32, #tpu.memory_space<vmem>>, %arg6: memref<256x256xf32, #tpu.memory_space<vmem>>, %arg7: memref<256x256xf32, #tpu.memory_space<vmem>>, %arg8: memref<2x8x256xf32, #tpu.memory_space<vmem>>) attributes {dimension_semantics = [#tpu.dimension_semantics<parallel>], iteration_bounds = array<i64: 1>, scalar_prefetch = 0 : i64, scratch_operands = 0 : i64, tpu.core_type = #tpu.core_type<tc>, window_params = [{transform_indices = @transform_0, window_bounds = array<i64: 2, 8, 256>}, {pipeline_mode = #tpu.pipeline_mode<synchronous>, transform_indices = @transform_1, window_bounds = array<i64: 2, 8>}, {pipeline_mode = #tpu.pipeline_mode<synchronous>, transform_indices = @transform_2, window_bounds = array<i64: 1, 2>}, {pipeline_mode = #tpu.pipeline_mode<synchronous>, transform_indices = @transform_3, window_bounds = array<i64: 8, 2>}, {pipeline_mode = #tpu.pipeline_mode<synchronous>, transform_indices = @transform_4, window_bounds = array<i64: 1, 8>}, {pipeline_mode = #tpu.pipeline_mode<synchronous>, transform_indices = @transform_5, window_bounds = array<i64: 256, 256>}, {pipeline_mode = #tpu.pipeline_mode<synchronous>, transform_indices = @transform_6, window_bounds = array<i64: 256, 256>}, {transform_indices = @transform_7, window_bounds = array<i64: 2, 8, 256>}]} {
    %c0 = arith.constant 0 : index
    %c0_0 = arith.constant 0 : index
    %c0_1 = arith.constant 0 : index
    %0 = vector.load %arg1[%c0, %c0_0, %c0_1] : memref<2x8x256xf32, #tpu.memory_space<vmem>>, vector<2x8x256xf32>
    %c0_2 = arith.constant 0 : index
    %c0_3 = arith.constant 0 : index
    %1 = vector.load %arg2[%c0_2, %c0_3] : memref<2x8xf32, #tpu.memory_space<vmem>>, vector<2x8xf32>
    %c0_4 = arith.constant 0 : index
    %c0_5 = arith.constant 0 : index
    %2 = vector.load %arg3[%c0_4, %c0_5] : memref<1x2xf32, #tpu.memory_space<vmem>>, vector<1x2xf32>
    %c0_6 = arith.constant 0 : index
    %c0_7 = arith.constant 0 : index
    %3 = vector.load %arg4[%c0_6, %c0_7] : memref<8x2xf32, #tpu.memory_space<vmem>>, vector<8x2xf32>
    %c0_8 = arith.constant 0 : index
    %c0_9 = arith.constant 0 : index
    %4 = vector.load %arg5[%c0_8, %c0_9] : memref<1x8xf32, #tpu.memory_space<vmem>>, vector<1x8xf32>
    %cst = arith.constant dense<0xFF800000> : vector<2x8xf32>
    %5 = vector.multi_reduction <maximumf>, %0, %cst [2] : vector<2x8x256xf32> to vector<2x8xf32>
    %cst_10 = arith.constant dense<0.000000e+00> : vector<2x8xf32>
    %6 = vector.multi_reduction <add>, %0, %cst_10 [2] : vector<2x8x256xf32> to vector<2x8xf32>
    %cst_11 = arith.constant 3.906250e-03 : f32
    %7 = vector.broadcast %cst_11 : f32 to vector<2x8xf32>
    %8 = arith.mulf %6, %7 : vector<2x8xf32>
    %9 = vector.shape_cast %5 : vector<2x8xf32> to vector<2x1x8xf32>
    %10 = vector.shape_cast %1 : vector<2x8xf32> to vector<1x2x8xf32>
    %11 = vector.broadcast %9 : vector<2x1x8xf32> to vector<2x2x8xf32>
    %12 = vector.broadcast %10 : vector<1x2x8xf32> to vector<2x2x8xf32>
    %13 = arith.mulf %11, %12 : vector<2x2x8xf32>
    %cst_12 = arith.constant dense<0.000000e+00> : vector<2x2xf32>
    %14 = vector.multi_reduction <add>, %13, %cst_12 [2] : vector<2x2x8xf32> to vector<2x2xf32>
    %15 = vector.broadcast %2 : vector<1x2xf32> to vector<2x2xf32>
    %16 = arith.addf %14, %15 : vector<2x2xf32>
    %cst_13 = arith.constant 0.000000e+00 : f32
    %17 = vector.broadcast %cst_13 : f32 to vector<2x2xf32>
    %18 = arith.maximumf %16, %17 : vector<2x2xf32>
    %19 = vector.shape_cast %18 : vector<2x2xf32> to vector<2x1x2xf32>
    %20 = vector.shape_cast %3 : vector<8x2xf32> to vector<1x8x2xf32>
    %21 = vector.broadcast %19 : vector<2x1x2xf32> to vector<2x8x2xf32>
    %22 = vector.broadcast %20 : vector<1x8x2xf32> to vector<2x8x2xf32>
    %23 = arith.mulf %21, %22 : vector<2x8x2xf32>
    %cst_14 = arith.constant dense<0.000000e+00> : vector<2x8xf32>
    %24 = vector.multi_reduction <add>, %23, %cst_14 [2] : vector<2x8x2xf32> to vector<2x8xf32>
    %25 = vector.shape_cast %8 : vector<2x8xf32> to vector<2x1x8xf32>
    %26 = vector.shape_cast %1 : vector<2x8xf32> to vector<1x2x8xf32>
    %27 = vector.broadcast %25 : vector<2x1x8xf32> to vector<2x2x8xf32>
    %28 = vector.broadcast %26 : vector<1x2x8xf32> to vector<2x2x8xf32>
    %29 = arith.mulf %27, %28 : vector<2x2x8xf32>
    %cst_15 = arith.constant dense<0.000000e+00> : vector<2x2xf32>
    %30 = vector.multi_reduction <add>, %29, %cst_15 [2] : vector<2x2x8xf32> to vector<2x2xf32>
    %31 = vector.broadcast %2 : vector<1x2xf32> to vector<2x2xf32>
    %32 = arith.addf %30, %31 : vector<2x2xf32>
    %cst_16 = arith.constant 0.000000e+00 : f32
    %33 = vector.broadcast %cst_16 : f32 to vector<2x2xf32>
    %34 = arith.maximumf %32, %33 : vector<2x2xf32>
    %35 = vector.shape_cast %34 : vector<2x2xf32> to vector<2x1x2xf32>
    %36 = vector.shape_cast %3 : vector<8x2xf32> to vector<1x8x2xf32>
    %37 = vector.broadcast %35 : vector<2x1x2xf32> to vector<2x8x2xf32>
    %38 = vector.broadcast %36 : vector<1x8x2xf32> to vector<2x8x2xf32>
    %39 = arith.mulf %37, %38 : vector<2x8x2xf32>
    %cst_17 = arith.constant dense<0.000000e+00> : vector<2x8xf32>
    %40 = vector.multi_reduction <add>, %39, %cst_17 [2] : vector<2x8x2xf32> to vector<2x8xf32>
    %41 = arith.addf %24, %40 : vector<2x8xf32>
    %cst_18 = arith.constant 2.000000e+00 : f32
    %42 = vector.broadcast %cst_18 : f32 to vector<1x8xf32>
    %43 = arith.mulf %42, %4 : vector<1x8xf32>
    %44 = vector.broadcast %43 : vector<1x8xf32> to vector<2x8xf32>
    %45 = arith.addf %41, %44 : vector<2x8xf32>
    %46 = arith.negf %45 : vector<2x8xf32>
    %47 = math.exp %46 : vector<2x8xf32>
    %cst_19 = arith.constant 1.000000e+00 : f32
    %48 = vector.broadcast %cst_19 : f32 to vector<2x8xf32>
    %49 = arith.addf %48, %47 : vector<2x8xf32>
    %50 = arith.divf %48, %49 : vector<2x8xf32>
    %51 = vector.shape_cast %50 : vector<2x8xf32> to vector<2x8x1xf32>
    %52 = vector.broadcast %51 : vector<2x8x1xf32> to vector<2x8x256xf32>
    %53 = arith.mulf %0, %52 : vector<2x8x256xf32>
    %cst_20 = arith.constant dense<0xFF800000> : vector<2x256xf32>
    %54 = vector.multi_reduction <maximumf>, %53, %cst_20 [1] : vector<2x8x256xf32> to vector<2x256xf32>
    %cst_21 = arith.constant dense<0.000000e+00> : vector<2x256xf32>
    %55 = vector.multi_reduction <add>, %53, %cst_21 [1] : vector<2x8x256xf32> to vector<2x256xf32>
    %cst_22 = arith.constant 1.250000e-01 : f32
    %56 = vector.broadcast %cst_22 : f32 to vector<2x256xf32>
    %57 = arith.mulf %55, %56 : vector<2x256xf32>
    %c0_23 = arith.constant 0 : index
    %c0_24 = arith.constant 0 : index
    %58 = vector.load %arg6[%c0_23, %c0_24] : memref<256x256xf32, #tpu.memory_space<vmem>>, vector<256x256xf32>
    %cst_25 = arith.constant dense<0.000000e+00> : vector<2x256xf32>
    %59 = tpu.matmul %54, %58, %cst_25 {dimension_numbers = #tpu.dot_dimension_numbers<[1], [0], [0], [1], [0, 0, 1, 1], [], []>} : vector<2x256xf32>, vector<256x256xf32>, vector<2x256xf32> -> vector<2x256xf32>
    %c0_26 = arith.constant 0 : index
    %c0_27 = arith.constant 0 : index
    %60 = vector.load %arg7[%c0_26, %c0_27] : memref<256x256xf32, #tpu.memory_space<vmem>>, vector<256x256xf32>
    %cst_28 = arith.constant dense<0.000000e+00> : vector<2x256xf32>
    %61 = tpu.matmul %57, %60, %cst_28 {dimension_numbers = #tpu.dot_dimension_numbers<[1], [0], [0], [1], [0, 0, 1, 1], [], []>} : vector<2x256xf32>, vector<256x256xf32>, vector<2x256xf32> -> vector<2x256xf32>
    %62 = arith.addf %59, %61 : vector<2x256xf32>
    %63 = arith.negf %62 : vector<2x256xf32>
    %64 = math.exp %63 : vector<2x256xf32>
    %cst_29 = arith.constant 1.000000e+00 : f32
    %65 = vector.broadcast %cst_29 : f32 to vector<2x256xf32>
    %66 = arith.addf %65, %64 : vector<2x256xf32>
    %67 = arith.divf %65, %66 : vector<2x256xf32>
    %68 = vector.shape_cast %67 : vector<2x256xf32> to vector<2x1x256xf32>
    %69 = vector.broadcast %68 : vector<2x1x256xf32> to vector<2x8x256xf32>
    %70 = arith.mulf %53, %69 : vector<2x8x256xf32>
    %c0_30 = arith.constant 0 : index
    %c0_31 = arith.constant 0 : index
    %c0_32 = arith.constant 0 : index
    %71 = vector.load %arg8[%c0_30, %c0_31, %c0_32] : memref<2x8x256xf32, #tpu.memory_space<vmem>>, vector<2x8x256xf32>
    tpu.vector_store %arg8[%c0_30, %c0_31, %c0_32], %70 {strides = array<i32>} : memref<2x8x256xf32, #tpu.memory_space<vmem>>, vector<2x8x256xf32>,
    return
  }
  func.func @transform_0(%arg0: i32) -> (i32, i32, i32) {
    %c0_i32 = arith.constant 0 : i32
    %c0_i32_0 = arith.constant 0 : i32
    %c0_i32_1 = arith.constant 0 : i32
    return %arg0, %c0_i32, %c0_i32_0 : i32, i32, i32
  }
  func.func @transform_1(%arg0: i32) -> (i32, i32) {
    %c0_i32 = arith.constant 0 : i32
    %c0_i32_0 = arith.constant 0 : i32
    %c0_i32_1 = arith.constant 0 : i32
    return %c0_i32, %c0_i32_0 : i32, i32
  }
  func.func @transform_2(%arg0: i32) -> (i32, i32) {
    %c0_i32 = arith.constant 0 : i32
    %c0_i32_0 = arith.constant 0 : i32
    %c0_i32_1 = arith.constant 0 : i32
    return %c0_i32, %c0_i32_0 : i32, i32
  }
  func.func @transform_3(%arg0: i32) -> (i32, i32) {
    %c0_i32 = arith.constant 0 : i32
    %c0_i32_0 = arith.constant 0 : i32
    %c0_i32_1 = arith.constant 0 : i32
    return %c0_i32, %c0_i32_0 : i32, i32
  }
  func.func @transform_4(%arg0: i32) -> (i32, i32) {
    %c0_i32 = arith.constant 0 : i32
    %c0_i32_0 = arith.constant 0 : i32
    %c0_i32_1 = arith.constant 0 : i32
    return %c0_i32, %c0_i32_0 : i32, i32
  }
  func.func @transform_5(%arg0: i32) -> (i32, i32) {
    %c0_i32 = arith.constant 0 : i32
    %c0_i32_0 = arith.constant 0 : i32
    %c0_i32_1 = arith.constant 0 : i32
    return %c0_i32, %c0_i32_0 : i32, i32
  }
  func.func @transform_6(%arg0: i32) -> (i32, i32) {
    %c0_i32 = arith.constant 0 : i32
    %c0_i32_0 = arith.constant 0 : i32
    %c0_i32_1 = arith.constant 0 : i32
    return %c0_i32, %c0_i32_0 : i32, i32
  }
  func.func @transform_7(%arg0: i32) -> (i32, i32, i32) {
    %c0_i32 = arith.constant 0 : i32
    %c0_i32_0 = arith.constant 0 : i32
    %c0_i32_1 = arith.constant 0 : i32
    return %arg0, %c0_i32, %c0_i32_0 : i32, i32, i32
  }
}

</mosaic_0001>

<bundles_post_ra>
// kernel: tpu_custom_call.1
= control target key start
LH: loop header
LB: loop body
LE: loop exit
PB: predicated region body
PF: predicated region fallthrough
CT: control target
= control target key end

     0   :  { %12 = vsyncpa [#allocation3], 0  ;;  %s1636_s0 = inlined_call_operand.hbm [shape: f32[2,8,256], index: 0, kind: input, shape index: {}]   ;;  %s1637_s1 = inlined_call_operand.vmem [shape: f32[2,8], index: 1, kind: input, shape index: {}]   ;;  %s1638_s2 = inlined_call_operand.vmem [shape: f32[1,2], index: 2, kind: input, shape index: {}]   ;;  %s1639_s3 = inlined_call_operand.vmem [shape: f32[8,2], index: 3, kind: input, shape index: {}]   ;;  %s1640_s4 = inlined_call_operand.vmem [shape: f32[1,8], index: 4, kind: input, shape index: {}]   ;;  %s1641_s5 = inlined_call_operand.hbm [shape: f32[256,256], index: 5, kind: input, shape index: {}]   ;;  %s1642_s6 = inlined_call_operand.hbm [shape: f32[256,256], index: 6, kind: input, shape index: {}]   ;;  %s1643_s7 = inlined_call_operand.hbm [shape: f32[2,8,256], index: 7, kind: output, shape index: {}]  }
   0x1   :  { %13 = vsyncpa [#allocation6], 0 }
   0x2   :  { %14 = vsyncpa [#allocation4], 0  ;;  %s1344_s24 = smov [#allocation5]   ;;  %s1345_s26 = smov [#allocation2]  }
   0x3   :  { %s40_s25 = sshll.u32 %s1344_s24, 4  ;;  %s20_s27 = sshll.u32 %s1345_s26, 4  ;;  %s41_s25 = int_to_ptr.vmem [resolvable:$true] %s40_s25  ;;  %s1392_s27 = int_to_ptr.vmem [resolvable:$true] %s20_s27 }
   0x4   :  { %s1250_s30 = scalar_lea.hbm %s1641_s5, 8192 }
   0x5   :  { %p1251_p0 = scmp.ne.s32.totalorder %s1641_s5, %s1250_s30  ;;  %p1254_p1 = scmp.lt.u32.totalorder %s1250_s30, %s1641_s5 }
   0x7   :  { %p1256_p2 = pnand %p1254_p1, %p1251_p0 }
   0x9   :  { %1259 = shalt.err (!%p1256_p2)
}
   0xa   :  { %s1260_s12 = scalar_lea.vmem %s41_s25, 8192  ;;  %p1265_p4 = scmp.lt.s32.totalorder %s41_s25, %s41_s25 }
   0xb   :  { %p1261_p3 = scmp.ne.s32.totalorder %s41_s25, %s1260_s12  ;;  %p1266_p5 = scmp.lt.s32.totalorder %s1260_s12, %s1260_s12 }
   0xd   :  { %p1267_p6 = por %p1266_p5, %p1265_p4 }
   0xf   :  { %p1268_p7 = pnand %p1267_p6, %p1261_p3 }
  0x11   :  { %1271 = shalt.err (!%p1268_p7)
}
  0x12   :  { %s1346_s13 = smov 256   ;;  %s1347_s14 = smov 16  }
  0x13   :  { %46 = dma.hbm_to_vmem [thread:$0]  %s1641_s5, 8192, %s41_s25, [#allocation6], %s1346_s13, %s1346_s13, %s1347_s14  }
  0x14   :  { %s1272_s19 = scalar_lea.hbm %s1636_s0, 512 }
  0x15   :  { %p1273_p8 = scmp.ne.s32.totalorder %s1636_s0, %s1272_s19  ;;  %p1276_p9 = scmp.lt.u32.totalorder %s1272_s19, %s1636_s0 }
  0x17   :  { %p1278_p10 = pnand %p1276_p9, %p1273_p8 }
  0x19   :  { %1281 = shalt.err (!%p1278_p10)
}
  0x1a   :  { %s1282_s24 = scalar_lea.vmem %s1392_s27, 512  ;;  %p1287_p12 = scmp.lt.s32.totalorder %s1392_s27, %s1392_s27 }
  0x1b   :  { %p1283_p11 = scmp.ne.s32.totalorder %s1392_s27, %s1282_s24  ;;  %p1288_p13 = scmp.lt.s32.totalorder %s1282_s24, %s1282_s24 }
  0x1d   :  { %p1289_p0 = por %p1288_p13, %p1287_p12 }
  0x1f   :  { %p1290_p1 = pnand %p1289_p0, %p1283_p11 }
  0x21   :  { %1293 = shalt.err (!%p1290_p1)
}
  0x22   :  { %26 = dma.hbm_to_vmem [thread:$0]  %s1636_s0, 512, %s1392_s27, [#allocation3], %s1346_s13, %s1346_s13, %s1347_s14  }
  0x23   :  { %s1348_s26 = smov [#allocation7]   ;;  %s1294_s8 = scalar_lea.hbm %s1642_s6, 8192 }
  0x24   :  { %s52_s28 = sshll.u32 %s1348_s26, 4  ;;  %p1295_p2 = scmp.ne.s32.totalorder %s1642_s6, %s1294_s8  ;;  %s53_s28 = int_to_ptr.vmem [resolvable:$true] %s52_s28 }
  0x25   :  { %p1298_p3 = scmp.lt.u32.totalorder %s1294_s8, %s1642_s6 }
  0x27   :  { %p1300_p4 = pnand %p1298_p3, %p1295_p2 }
  0x29   :  { %1303 = shalt.err (!%p1300_p4)
}
  0x2a   :  { %s1304_s15 = scalar_lea.vmem %s53_s28, 8192  ;;  %p1309_p6 = scmp.lt.s32.totalorder %s53_s28, %s53_s28 }
  0x2b   :  { %p1305_p5 = scmp.ne.s32.totalorder %s53_s28, %s1304_s15  ;;  %p1310_p7 = scmp.lt.s32.totalorder %s1304_s15, %s1304_s15 }
  0x2d   :  { %p1311_p8 = por %p1310_p7, %p1309_p6 }
  0x2f   :  { %p1312_p9 = pnand %p1311_p8, %p1305_p5 }
  0x31   :  { %1315 = shalt.err (!%p1312_p9)
}
  0x32   :  { %58 = dma.hbm_to_vmem [thread:$0]  %s1642_s6, 8192, %s53_s28, [#allocation6], %s1346_s13, %s1346_s13, %s1347_s14  }
  0x33   :  { %1338 = dma.done.wait [#allocation3], 512  }
  0x34   :  { %1339 = vsyncadd [#allocation3], 4294966784 }
  0x35   :  { %1340 = dma.done.wait [#allocation6], 16384  }
  0x36   :  { %1341 = vsyncadd [#allocation6], 4294950912  ;;  %v68_v0 = vld [vmem:[#allocation2] sm:$0xff]  ;;  %v69_v1 = vld [vmem:[#allocation2 + $0x8] sm:$0xff]  ;;  %v91_v8 = vlaneseq  ;;  %v1349_v15 = vmov 0   ;;  %vm145_vm0 = vcmask 1041409  }
  0x37   :  { %v70_v2 = vld [vmem:[#allocation2 + $0x10] sm:$0xff]  ;;  %v82_v3 = vadd.f32 %v69_v1, %v68_v0  ;;  %v76_v4 = vmax.f32 %v68_v0, %v69_v1  ;;  %v71_v5 = vld [vmem:[#allocation2 + $0x18] sm:$0xff]  ;;  %v72_v11 = vld [vmem:[%s1637_s1] sm:$0x3]  ;;  %1229 = vset.pattern.permute.xlu0 %v1349_v15  ;;  %1228 = vset.pattern.permute.xlu1 %v1349_v15  ;;  %vm150_vm1 = vcmask 58368   ;;  %vm380_vm2 = vcmask 1042434  }
  0x38   :  { %v85_v6 = vadd.f32 %v71_v5, %v70_v2  ;;  %v79_v7 = vmax.f32 %v70_v2, %v71_v5  ;;  %v1444_v9 = vshrl.u32 %v91_v8, 7  ;;  %v74_v30 = vld [vmem:[%s1639_s3] sm:$0xff]  ;;  %v128_v48 = vand.u32 127, %v91_v8 }
  0x39   :  { %83 = vadd.xlane.f32.xlu0 %v82_v3  ;;  %77 = vmax.xlane.f32.xlu1 %v76_v4  ;;  %v1085_v38 = vld [vmem:[%s1638_s2] ss:$0 sm:$0xff]  ;;  %vm382_vm3 = vcmask 1043459   ;;  %vm384_vm4 = vcmask 1044484   ;;  %vm386_vm5 = vcmask 1045509   ;;  %vm388_vm6 = vcmask 1046534  }
  0x3a   :  { %v1447_v10 = vsub.s32 1, %v1444_v9  ;;  %v1454_v13 = vsub.s32 0, %v1444_v9  ;;  %v201_v32 = vsub.s32 4, %v1444_v9  ;;  %v215_v35 = vsub.s32 6, %v1444_v9 }
  0x3b   :  { %v187_v40 = vsub.s32 2, %v1444_v9  ;;  %v194_v42 = vsub.s32 3, %v1444_v9  ;;  %v208_v44 = vsub.s32 5, %v1444_v9  ;;  %v222_v46 = vsub.s32 7, %v1444_v9 }
  0x3c   :  { %v101_v12 = vrot.slane %v72_v11, %v1447_v10  ;;  %v94_v14 = vrot.slane %v72_v11, %v1454_v13  ;;  %v174_v31 = vrot.slane %v74_v30, %v1454_v13  ;;  %v202_v34 = vrot.slane %v74_v30, %v201_v32 }
  0x3d   :  { %86 = vadd.xlane.f32.xlu0 %v85_v6  ;;  %80 = vmax.xlane.f32.xlu1 %v79_v7  ;;  %v216_v37 = vrot.slane %v74_v30, %v215_v35  ;;  %v181_v39 = vrot.slane %v74_v30, %v1447_v10  ;;  %v188_v41 = vrot.slane %v74_v30, %v187_v40  ;;  %vm390_vm7 = vcmask 1047559  }
  0x3e   :  { %v195_v43 = vrot.slane %v74_v30, %v194_v42  ;;  %v209_v45 = vrot.slane %v74_v30, %v208_v44  ;;  %v223_v47 = vrot.slane %v74_v30, %v222_v46  ;;  %v1472_v50 = vsub.s32 %v128_v48, %v1444_v9 }
  0x3f   :  { %vm401_vm8 = vcmask 15360  }
  0x4e   :  { %103 = vbcast.lane.b32.xlu1 %v101_v12, 256 }
  0x53   :  { %96 = vbcast.lane.b32.xlu0 %v94_v14, 256 }
  0xc6   :  { %v84_v16 = vpop.xlane.xlu0 %83  ;;  %v78_v17 = vpop.xlane.xlu1 %77 }
  0xc7   :  { %v88_v24 = vmul.f32 0.00390625, %v84_v16 }
  0xca   :  { %v87_v18 = vpop.xlane.xlu0 %86  ;;  %v81_v19 = vpop.xlane.xlu1 %80 }
  0xcb   :  { %v89_v27 = vmul.f32 0.00390625, %v87_v18 }
  0xce   :  { %v97_v20 = vpop.permute.xlu0 %96  ;;  %v104_v23 = vpop.permute.xlu1 %103 }
  0xcf   :  { %v107_v21 = vmul.f32 %v97_v20, %v78_v17  ;;  %v109_v22 = vmul.f32 %v97_v20, %v81_v19  ;;  %v409_v25 = vmul.f32 %v104_v23, %v88_v24  ;;  %v108_v26 = vmul.f32 %v104_v23, %v78_v17 }
  0xd0   :  { %v411_v28 = vmul.f32 %v104_v23, %v89_v27  ;;  %v110_v29 = vmul.f32 %v104_v23, %v81_v19  ;;  %v408_v33 = vmul.f32 %v97_v20, %v88_v24  ;;  %v410_v36 = vmul.f32 %v97_v20, %v89_v27 }
  0xd1   :  { %116 = vperm.xlu1 %1228, %v107_v21   ;;  %122 = vperm.xlu0 %1229, %v109_v22  }
  0xd5   :  { %420 = vperm.xlu0 %1229, %v409_v25   ;;  %119 = vperm.xlu1 %1228, %v108_v26  }
  0xd9   :  { %426 = vperm.xlu0 %1229, %v411_v28   ;;  %125 = vperm.xlu1 %1228, %v110_v29  }
  0xdd   :  { %417 = vperm.xlu1 %1228, %v408_v33   ;;  %176 = vbcast.lane.b32.xlu0 %v174_v31, 256 }
  0xe1   :  { %423 = vperm.xlu1 %1228, %v410_v36   ;;  %204 = vbcast.lane.b32.xlu0 %v202_v34, 256 }
  0xe5   :  { %163 = vbcast.lane.b32.xlu1 %v1085_v38, 256  ;;  %218 = vbcast.lane.b32.xlu0 %v216_v37, 256 }
  0xe9   :  { %183 = vbcast.lane.b32.xlu1 %v181_v39, 256 }
  0xed   :  { %190 = vbcast.lane.b32.xlu1 %v188_v41, 256 }
  0xf1   :  { %197 = vbcast.lane.b32.xlu1 %v195_v43, 256 }
  0xf5   :  { %211 = vbcast.lane.b32.xlu1 %v209_v45, 256 }
  0xf9   :  { %225 = vbcast.lane.b32.xlu1 %v223_v47, 256 }
 0x150   :  { %v117_v49 = vpop.permute.xlu1 %116  ;;  %v123_v51 = vpop.permute.xlu0 %122 }
 0x151   :  { %v132_v53 = vrot.slane %v117_v49, %v1472_v50  ;;  %v140_v59 = vrot.slane %v123_v51, %v1472_v50 }
 0x154   :  { %v120_v52 = vpop.permute.xlu1 %119  ;;  %v421_v56 = vpop.permute.xlu0 %420 }
 0x155   :  { %v136_v54 = vrot.slane %v120_v52, %v1472_v50  ;;  %v435_v0 = vrot.slane %v421_v56, %v1472_v50 }
 0x157   :  { %v146_v55 = vsel %vm145_vm0, %v136_v54, %v132_v53 }
 0x158   :  { %v126_v57 = vpop.permute.xlu1 %125  ;;  %v151_v58 = vsel %vm150_vm1, %v146_v55, 0.0  ;;  %v427_v2 = vpop.permute.xlu0 %426 }
 0x159   :  { %v144_v60 = vrot.slane %v126_v57, %v1472_v50  ;;  %152 = vadd.xlane.f32.xlu1 %v151_v58  ;;  %v443_v6 = vrot.slane %v427_v2, %v1472_v50 }
 0x15b   :  { %v147_v61 = vsel %vm145_vm0, %v144_v60, %v140_v59 }
 0x15c   :  { %v418_v62 = vpop.permute.xlu1 %417  ;;  %v154_v63 = vsel %vm150_vm1, %v147_v61, 0.0  ;;  %v177_v17 = vpop.permute.xlu0 %176 }
 0x15d   :  { %v431_v1 = vrot.slane %v418_v62, %v1472_v50  ;;  %155 = vadd.xlane.f32.xlu0 %v154_v63 }
 0x15f   :  { %v444_v3 = vsel %vm145_vm0, %v435_v0, %v431_v1 }
 0x160   :  { %v424_v4 = vpop.permute.xlu1 %423  ;;  %v448_v5 = vsel %vm150_vm1, %v444_v3, 0.0  ;;  %v1494_v19 = vpop.permute.xlu0 %204 }
 0x161   :  { %v439_v7 = vrot.slane %v424_v4, %v1472_v50  ;;  %449 = vadd.xlane.f32.xlu0 %v448_v5 }
 0x163   :  { %v445_v8 = vsel %vm145_vm0, %v443_v6, %v439_v7 }
 0x164   :  { %v451_v11 = vsel %vm150_vm1, %v445_v8, 0.0  ;;  %v164_v12 = vpop.permute.xlu1 %163  ;;  %v1498_v21 = vpop.permute.xlu0 %218 }
 0x165   :  { %452 = vadd.xlane.f32.xlu0 %v451_v11 }
 0x168   :  { %v184_v14 = vpop.permute.xlu1 %183 }
 0x16c   :  { %v191_v15 = vpop.permute.xlu1 %190 }
 0x170   :  { %v1490_v16 = vpop.permute.xlu1 %197 }
 0x174   :  { %v1492_v18 = vpop.permute.xlu1 %211 }
 0x178   :  { %v1496_v20 = vpop.permute.xlu1 %225 }
 0x1e6   :  { %v153_v22 = vpop.xlane.xlu1 %152 }
 0x1e7   :  { %v166_v23 = vadd.f32 %v164_v12, %v153_v22 }
 0x1e9   :  { %v168_v24 = vmax.f32 %v166_v23, 0.0 }
 0x1ea   :  { %v156_v25 = vpop.xlane.xlu0 %155 }
 0x1eb   :  { %v167_v26 = vadd.f32 %v164_v12, %v156_v25  ;;  %v236_v27 = vmul.f32 %v184_v14, %v168_v24  ;;  %v235_v28 = vmul.f32 %v177_v17, %v168_v24  ;;  %v237_v33 = vmul.f32 %v191_v15, %v168_v24 }
 0x1ec   :  { %v238_v35 = vmul.f32 %v1490_v16, %v168_v24  ;;  %v239_v37 = vmul.f32 %v1494_v19, %v168_v24  ;;  %v240_v40 = vmul.f32 %v1492_v18, %v168_v24  ;;  %v241_v43 = vmul.f32 %v1498_v21, %v168_v24 }
 0x1ed   :  { %v169_v29 = vmax.f32 %v167_v26, 0.0  ;;  %271 = vperm.xlu1 %1228, %v236_v27   ;;  %268 = vperm.xlu0 %1229, %v235_v28   ;;  %v242_v48 = vmul.f32 %v1496_v20, %v168_v24 }
 0x1ee   :  { %v450_v38 = vpop.xlane.xlu0 %449 }
 0x1ef   :  { %v244_v30 = vmul.f32 %v184_v14, %v169_v29  ;;  %v243_v31 = vmul.f32 %v177_v17, %v169_v29  ;;  %v245_v32 = vmul.f32 %v191_v15, %v169_v29  ;;  %v246_v34 = vmul.f32 %v1490_v16, %v169_v29 }
 0x1f0   :  { %v247_v36 = vmul.f32 %v1494_v19, %v169_v29  ;;  %v248_v39 = vmul.f32 %v1492_v18, %v169_v29  ;;  %v454_v41 = vadd.f32 %v450_v38, %v164_v12  ;;  %v249_v42 = vmul.f32 %v1498_v21, %v169_v29 }
 0x1f1   :  { %295 = vperm.xlu1 %1228, %v244_v30   ;;  %292 = vperm.xlu0 %1229, %v243_v31   ;;  %v250_v47 = vmul.f32 %v1496_v20, %v169_v29 }
 0x1f2   :  { %v453_v44 = vpop.xlane.xlu0 %452  ;;  %v456_v45 = vmax.f32 %v454_v41, 0.0 }
 0x1f3   :  { %v455_v46 = vadd.f32 %v453_v44, %v164_v12 }
 0x1f4   :  { %v459_v51 = vmul.f32 %v456_v45, %v184_v14  ;;  %v458_v52 = vmul.f32 %v456_v45, %v177_v17  ;;  %v460_v56 = vmul.f32 %v456_v45, %v191_v15  ;;  %v461_v58 = vmul.f32 %v456_v45, %v1490_v16 }
 0x1f5   :  { %298 = vperm.xlu1 %1228, %v245_v32   ;;  %274 = vperm.xlu0 %1229, %v237_v33   ;;  %v457_v49 = vmax.f32 %v455_v46, 0.0  ;;  %v462_v60 = vmul.f32 %v456_v45, %v1494_v19  ;;  %v463_v62 = vmul.f32 %v456_v45, %v1492_v18  ;;  %v464_v0 = vmul.f32 %v456_v45, %v1498_v21 }
 0x1f6   :  { %v465_v2 = vmul.f32 %v456_v45, %v1496_v20 }
 0x1f7   :  { %v467_v53 = vmul.f32 %v457_v49, %v184_v14  ;;  %v466_v54 = vmul.f32 %v457_v49, %v177_v17  ;;  %v468_v55 = vmul.f32 %v457_v49, %v191_v15  ;;  %v469_v57 = vmul.f32 %v457_v49, %v1490_v16 }
 0x1f8   :  { %v470_v59 = vmul.f32 %v457_v49, %v1494_v19  ;;  %v471_v61 = vmul.f32 %v457_v49, %v1492_v18  ;;  %v472_v63 = vmul.f32 %v457_v49, %v1498_v21  ;;  %v473_v1 = vmul.f32 %v457_v49, %v1496_v20 }
 0x1f9   :  { %301 = vperm.xlu1 %1228, %v246_v34   ;;  %277 = vperm.xlu0 %1229, %v238_v35  }
 0x1fd   :  { %304 = vperm.xlu1 %1228, %v247_v36   ;;  %280 = vperm.xlu0 %1229, %v239_v37  }
 0x201   :  { %307 = vperm.xlu1 %1228, %v248_v39   ;;  %283 = vperm.xlu0 %1229, %v240_v40  }
 0x205   :  { %310 = vperm.xlu1 %1228, %v249_v42   ;;  %286 = vperm.xlu0 %1229, %v241_v43  }
 0x209   :  { %313 = vperm.xlu1 %1228, %v250_v47   ;;  %289 = vperm.xlu0 %1229, %v242_v48  }
 0x20d   :  { %494 = vperm.xlu1 %1228, %v459_v51   ;;  %491 = vperm.xlu0 %1229, %v458_v52  }
 0x211   :  { %518 = vperm.xlu1 %1228, %v467_v53   ;;  %515 = vperm.xlu0 %1229, %v466_v54  }
 0x215   :  { %521 = vperm.xlu1 %1228, %v468_v55   ;;  %497 = vperm.xlu0 %1229, %v460_v56  }
 0x219   :  { %524 = vperm.xlu1 %1228, %v469_v57   ;;  %500 = vperm.xlu0 %1229, %v461_v58  }
 0x21d   :  { %527 = vperm.xlu1 %1228, %v470_v59   ;;  %503 = vperm.xlu0 %1229, %v462_v60  }
 0x221   :  { %530 = vperm.xlu1 %1228, %v471_v61   ;;  %506 = vperm.xlu0 %1229, %v463_v62  }
 0x225   :  { %533 = vperm.xlu1 %1228, %v472_v63   ;;  %509 = vperm.xlu0 %1229, %v464_v0  }
 0x229   :  { %536 = vperm.xlu1 %1228, %v473_v1   ;;  %512 = vperm.xlu0 %1229, %v465_v2  }
 0x26c   :  { %v272_v3 = vpop.permute.xlu1 %271  ;;  %v269_v4 = vpop.permute.xlu0 %268 }
 0x26d   :  { %v322_v18 = vrot.slane %v272_v3, %v1472_v50  ;;  %v318_v19 = vrot.slane %v269_v4, %v1472_v50 }
 0x26f   :  { %v379_v30 = vsel %vm145_vm0, %v322_v18, %v318_v19 }
 0x270   :  { %v296_v5 = vpop.permute.xlu1 %295  ;;  %v293_v6 = vpop.permute.xlu0 %292 }
 0x271   :  { %v354_v20 = vrot.slane %v296_v5, %v1472_v50  ;;  %v350_v21 = vrot.slane %v293_v6, %v1472_v50 }
 0x273   :  { %v392_v31 = vsel %vm145_vm0, %v354_v20, %v350_v21 }
 0x274   :  { %v299_v7 = vpop.permute.xlu1 %298  ;;  %v275_v8 = vpop.permute.xlu0 %274 }
 0x275   :  { %v358_v22 = vrot.slane %v299_v7, %v1472_v50  ;;  %v326_v23 = vrot.slane %v275_v8, %v1472_v50 }
 0x277   :  { %v393_v34 = vsel %vm380_vm2, %v358_v22, %v392_v31  ;;  %v381_v35 = vsel %vm380_vm2, %v326_v23, %v379_v30 }
 0x278   :  { %v302_v11 = vpop.permute.xlu1 %301  ;;  %v278_v12 = vpop.permute.xlu0 %277 }
 0x279   :  { %v362_v24 = vrot.slane %v302_v11, %v1472_v50  ;;  %v330_v25 = vrot.slane %v278_v12, %v1472_v50 }
 0x27b   :  { %v394_v38 = vsel %vm382_vm3, %v362_v24, %v393_v34  ;;  %v383_v39 = vsel %vm382_vm3, %v330_v25, %v381_v35 }
 0x27c   :  { %v305_v14 = vpop.permute.xlu1 %304  ;;  %v281_v15 = vpop.permute.xlu0 %280 }
 0x27d   :  { %v366_v26 = vrot.slane %v305_v14, %v1472_v50  ;;  %v334_v27 = vrot.slane %v281_v15, %v1472_v50 }
 0x27f   :  { %v395_v40 = vsel %vm384_vm4, %v366_v26, %v394_v38  ;;  %v385_v41 = vsel %vm384_vm4, %v334_v27, %v383_v39 }
 0x280   :  { %v308_v16 = vpop.permute.xlu1 %307  ;;  %v284_v17 = vpop.permute.xlu0 %283 }
 0x281   :  { %v370_v32 = vrot.slane %v308_v16, %v1472_v50  ;;  %v338_v33 = vrot.slane %v284_v17, %v1472_v50 }
 0x283   :  { %v396_v44 = vsel %vm386_vm5, %v370_v32, %v395_v40  ;;  %v387_v45 = vsel %vm386_vm5, %v338_v33, %v385_v41 }
 0x284   :  { %v311_v28 = vpop.permute.xlu1 %310  ;;  %v287_v29 = vpop.permute.xlu0 %286 }
 0x285   :  { %v374_v36 = vrot.slane %v311_v28, %v1472_v50  ;;  %v342_v37 = vrot.slane %v287_v29, %v1472_v50 }
 0x287   :  { %v397_v48 = vsel %vm388_vm6, %v374_v36, %v396_v44  ;;  %v389_v49 = vsel %vm388_vm6, %v342_v37, %v387_v45  ;;  %v717_v44 = vld [vmem:[#allocation5 + $0x8] sm:$0xff]  ;;  %v719_v45 = vld [vmem:[#allocation5 + $0x18] sm:$0xff] }
 0x288   :  { %v314_v42 = vpop.permute.xlu1 %313  ;;  %v290_v43 = vpop.permute.xlu0 %289 }
 0x289   :  { %v378_v46 = vrot.slane %v314_v42, %v1472_v50  ;;  %v346_v47 = vrot.slane %v290_v43, %v1472_v50 }
 0x28b   :  { %v398_v51 = vsel %vm390_vm7, %v378_v46, %v397_v48  ;;  %v391_v52 = vsel %vm390_vm7, %v346_v47, %v389_v49  ;;  %v716_v46 = vld [vmem:[#allocation5] sm:$0xff]  ;;  %v1154_v47 = vpack.c.bf16 %v719_v45, %v717_v44  ;;  %v718_v48 = vld [vmem:[#allocation5 + $0x10] sm:$0xff]  ;;  %v781_v49 = vld [vmem:[#allocation7 + $0x8] sm:$0xff] }
 0x28c   :  { %v495_v53 = vpop.permute.xlu1 %494  ;;  %v492_v54 = vpop.permute.xlu0 %491  ;;  %v405_v55 = vsel %vm401_vm8, %v398_v51, 0.0  ;;  %v402_v56 = vsel %vm401_vm8, %v391_v52, 0.0  ;;  %v783_v51 = vld [vmem:[#allocation7 + $0x18] sm:$0xff]  ;;  %v1156_v52 = vpack.c.bf16 %v718_v48, %v716_v46  ;;  %v736_v48 = vld [vmem:[#allocation5 + $0xa0] sm:$0xff] }
 0x28d   :  { %406 = vadd.xlane.f32.xlu1 %v405_v55  ;;  %403 = vadd.xlane.f32.xlu0 %v402_v56  ;;  %v545_v3 = vrot.slane %v495_v53, %v1472_v50  ;;  %v541_v4 = vrot.slane %v492_v54, %v1472_v50  ;;  %v1090_v53 = vpack.c.bf16 %v783_v51, %v781_v49  ;;  %v780_v54 = vld [vmem:[#allocation7] sm:$0xff]  ;;  %v782_v55 = vld [vmem:[#allocation7 + $0x10] sm:$0xff]  ;;  %v721_v56 = vld [vmem:[#allocation5 + $0x28] sm:$0xff] }
 0x28e   :  { %1155 = vmatprep.subr.bf16.mxu0 %v1154_v47  ;;  %v803_v44 = vld [vmem:[#allocation7 + $0xb8] sm:$0xff]  ;;  %v738_v49 = vld [vmem:[#allocation5 + $0xb0] sm:$0xff]  ;;  %v800_v51 = vld [vmem:[#allocation7 + $0xa0] sm:$0xff] }
 0x28f   :  { %v602_v16 = vsel %vm145_vm0, %v545_v3, %v541_v4  ;;  %1157 = vmatpush1.bf16.msra.mxu0 %v1156_v52  ;;  %1091 = vmatprep.subr.bf16.mxu1 %v1090_v53  ;;  %v786_v3 = vld [vmem:[#allocation7 + $0x30] sm:$0xff]  ;;  %v725_v4 = vld [vmem:[#allocation5 + $0x48] sm:$0xff] }
 0x290   :  { %v519_v57 = vpop.permute.xlu1 %518  ;;  %v516_v58 = vpop.permute.xlu0 %515  ;;  %v802_v53 = vld [vmem:[#allocation7 + $0xb0] sm:$0xff] }
 0x291   :  { %v577_v6 = vrot.slane %v519_v57, %v1472_v50  ;;  %v573_v7 = vrot.slane %v516_v58, %v1472_v50  ;;  %v1092_v57 = vpack.c.bf16 %v782_v55, %v780_v54  ;;  %v723_v58 = vld [vmem:[#allocation5 + $0x38] sm:$0xff]  ;;  %v741_v54 = vld [vmem:[#allocation5 + $0xc8] sm:$0xff] }
 0x292   :  { %v743_v55 = vld [vmem:[#allocation5 + $0xd8] sm:$0xff] }
 0x293   :  { %v609_v22 = vsel %vm145_vm0, %v577_v6, %v573_v7  ;;  %1093 = vmatpush1.bf16.msra.mxu1 %v1092_v57  ;;  %v807_v57 = vld [vmem:[#allocation7 + $0xd8] sm:$0xff] }
 0x294   :  { %v522_v59 = vpop.permute.xlu1 %521  ;;  %v498_v60 = vpop.permute.xlu0 %497 }
 0x295   :  { %v549_v5 = vrot.slane %v498_v60, %v1472_v50  ;;  %v581_v11 = vrot.slane %v522_v59, %v1472_v50  ;;  %v720_v59 = vld [vmem:[#allocation5 + $0x20] sm:$0xff]  ;;  %v722_v60 = vld [vmem:[#allocation5 + $0x30] sm:$0xff] }
 0x297   :  { %v603_v19 = vsel %vm380_vm2, %v549_v5, %v602_v16  ;;  %v610_v25 = vsel %vm380_vm2, %v581_v11, %v609_v22  ;;  %v727_v5 = vld [vmem:[#allocation5 + $0x58] sm:$0xff]  ;;  %v726_v11 = vld [vmem:[#allocation5 + $0x50] sm:$0xff] }
 0x298   :  { %v525_v61 = vpop.permute.xlu1 %524  ;;  %v501_v62 = vpop.permute.xlu0 %500  ;;  %v1162_v7 = vpack.c.bf16 %v727_v5, %v725_v4  ;;  %v790_v16 = vld [vmem:[#allocation7 + $0x50] sm:$0xff]  ;;  %v809_v4 = vld [vmem:[#allocation7 + $0xe8] sm:$0xff]  ;;  %v811_v5 = vld [vmem:[#allocation7 + $0xf8] sm:$0xff] }
 0x299   :  { %v553_v8 = vrot.slane %v501_v62, %v1472_v50  ;;  %v585_v17 = vrot.slane %v525_v61, %v1472_v50  ;;  %v1158_v61 = vpack.c.bf16 %v723_v58, %v721_v56  ;;  %v1160_v62 = vpack.c.bf16 %v722_v60, %v720_v59  ;;  %v805_v56 = vld [vmem:[#allocation7 + $0xc8] sm:$0xff] }
 0x29a   :  { %v1176_v58 = vpack.c.bf16 %v738_v49, %v736_v48  ;;  %v1112_v59 = vpack.c.bf16 %v802_v53, %v800_v51  ;;  %v1178_v60 = vpack.c.bf16 %v743_v55, %v741_v54  ;;  %v758_v48 = vld [vmem:[#allocation5 + $0x150] sm:$0xff]  ;;  %v820_v51 = vld [vmem:[#allocation7 + $0x140] sm:$0xff] }
 0x29b   :  { %v604_v23 = vsel %vm382_vm3, %v553_v8, %v603_v19  ;;  %v611_v30 = vsel %vm382_vm3, %v585_v17, %v610_v25  ;;  %1159 = vmatprep.subr.bf16.mxu0 %v1158_v61  ;;  %v724_v8 = vld [vmem:[#allocation5 + $0x40] sm:$0xff]  ;;  %v729_v19 = vld [vmem:[#allocation5 + $0x68] sm:$0xff] }
 0x29c   :  { %v528_v63 = vpop.permute.xlu1 %527  ;;  %v504_v0 = vpop.permute.xlu0 %503  ;;  %1161 = vmatpush1.bf16.msra.mxu0 %v1160_v62  ;;  %v1164_v17 = vpack.c.bf16 %v726_v11, %v724_v8  ;;  %v793_v25 = vld [vmem:[#allocation7 + $0x68] sm:$0xff]  ;;  %v740_v61 = vld [vmem:[#allocation5 + $0xc0] sm:$0xff]  ;;  %v742_v62 = vld [vmem:[#allocation5 + $0xd0] sm:$0xff] }
 0x29d   :  { %v557_v12 = vrot.slane %v504_v0, %v1472_v50  ;;  %v589_v20 = vrot.slane %v528_v63, %v1472_v50  ;;  %v785_v63 = vld [vmem:[#allocation7 + $0x28] sm:$0xff]  ;;  %v787_v0 = vld [vmem:[#allocation7 + $0x38] sm:$0xff]  ;;  %1163 = vmatprep.subr.bf16.mxu0 %v1162_v7  ;;  %v744_v11 = vld [vmem:[#allocation5 + $0xe0] sm:$0xff] }
 0x29f   :  { %v605_v26 = vsel %vm384_vm4, %v557_v12, %v604_v23  ;;  %v612_v34 = vsel %vm384_vm4, %v589_v20, %v611_v30  ;;  %v789_v12 = vld [vmem:[#allocation7 + $0x48] sm:$0xff]  ;;  %v731_v20 = vld [vmem:[#allocation5 + $0x78] sm:$0xff] }
 0x2a0   :  { %v531_v1 = vpop.permute.xlu1 %530  ;;  %v507_v2 = vpop.permute.xlu0 %506  ;;  %v1166_v23 = vpack.c.bf16 %v731_v20, %v729_v19  ;;  %v733_v30 = vld [vmem:[#allocation5 + $0x88] sm:$0xff]  ;;  %1165 = vmatpush1.bf16.msra.mxu0 %v1164_v17  ;;  %v815_v20 = vld [vmem:[#allocation7 + $0x118] sm:$0xff] }
 0x2a1   :  { %v561_v18 = vrot.slane %v507_v2, %v1472_v50  ;;  %v593_v24 = vrot.slane %v531_v1, %v1472_v50  ;;  %v784_v1 = vld [vmem:[#allocation7 + $0x20] sm:$0xff]  ;;  %v1094_v2 = vpack.c.bf16 %v787_v0, %v785_v63  ;;  %v1114_v0 = vpack.c.bf16 %v807_v57, %v805_v56  ;;  %v749_v17 = vld [vmem:[#allocation5 + $0x108] sm:$0xff] }
 0x2a2   :  { %v1096_v6 = vpack.c.bf16 %v786_v3, %v784_v1  ;;  %1167 = vmatprep.subr.bf16.mxu0 %v1166_v23  ;;  %v804_v63 = vld [vmem:[#allocation7 + $0xc0] sm:$0xff]  ;;  %v806_v1 = vld [vmem:[#allocation7 + $0xd0] sm:$0xff]  ;;  %v747_v3 = vld [vmem:[#allocation5 + $0xf8] sm:$0xff] }
 0x2a3   :  { %v606_v31 = vsel %vm386_vm5, %v561_v18, %v605_v26  ;;  %v613_v36 = vsel %vm386_vm5, %v593_v24, %v612_v34  ;;  %1095 = vmatprep.subr.bf16.mxu1 %v1094_v2  ;;  %v730_v24 = vld [vmem:[#allocation5 + $0x70] sm:$0xff]  ;;  %v795_v26 = vld [vmem:[#allocation7 + $0x78] sm:$0xff]  ;;  %v745_v2 = vld [vmem:[#allocation5 + $0xe8] sm:$0xff]  ;;  %v1116_v7 = vpack.c.bf16 %v806_v1, %v804_v63 }
 0x2a4   :  { %v534_v14 = vpop.permute.xlu1 %533  ;;  %v510_v15 = vpop.permute.xlu0 %509  ;;  %1097 = vmatpush1.bf16.msra.mxu1 %v1096_v6  ;;  %v799_v34 = vld [vmem:[#allocation7 + $0x98] sm:$0xff]  ;;  %v1180_v6 = vpack.c.bf16 %v742_v62, %v740_v61  ;;  %v1182_v8 = vpack.c.bf16 %v747_v3, %v745_v2  ;;  %v813_v19 = vld [vmem:[#allocation7 + $0x108] sm:$0xff] }
 0x2a5   :  { %v565_v21 = vrot.slane %v510_v15, %v1472_v50  ;;  %v597_v27 = vrot.slane %v534_v14, %v1472_v50  ;;  %v791_v14 = vld [vmem:[#allocation7 + $0x58] sm:$0xff]  ;;  %v788_v15 = vld [vmem:[#allocation7 + $0x40] sm:$0xff] }
 0x2a6   :  { %v1098_v18 = vpack.c.bf16 %v791_v14, %v789_v12  ;;  %v1100_v22 = vpack.c.bf16 %v790_v16, %v788_v15  ;;  %v746_v12 = vld [vmem:[#allocation5 + $0xf0] sm:$0xff]  ;;  %v808_v14 = vld [vmem:[#allocation7 + $0xe0] sm:$0xff]  ;;  %v1118_v15 = vpack.c.bf16 %v811_v5, %v809_v4 }
 0x2a7   :  { %v607_v35 = vsel %vm388_vm6, %v565_v21, %v606_v31  ;;  %v614_v39 = vsel %vm388_vm6, %v597_v27, %v613_v36  ;;  %v728_v21 = vld [vmem:[#allocation5 + $0x60] sm:$0xff]  ;;  %v1102_v27 = vpack.c.bf16 %v795_v26, %v793_v25  ;;  %v735_v31 = vld [vmem:[#allocation5 + $0x98] sm:$0xff]  ;;  %v810_v16 = vld [vmem:[#allocation7 + $0xf0] sm:$0xff] }
 0x2a8   :  { %v537_v28 = vpop.permute.xlu1 %536  ;;  %v513_v29 = vpop.permute.xlu0 %512  ;;  %1099 = vmatprep.subr.bf16.mxu1 %v1098_v18  ;;  %v1170_v36 = vpack.c.bf16 %v735_v31, %v733_v30  ;;  %v751_v18 = vld [vmem:[#allocation5 + $0x118] sm:$0xff]  ;;  %v750_v25 = vld [vmem:[#allocation5 + $0x110] sm:$0xff]  ;;  %v812_v26 = vld [vmem:[#allocation7 + $0x100] sm:$0xff] }
 0x2a9   :  { %v601_v32 = vrot.slane %v537_v28, %v1472_v50  ;;  %v569_v33 = vrot.slane %v513_v29, %v1472_v50  ;;  %v75_v50 = vld [vmem:[%s1640_s4] sm:$0x1]  ;;  %v794_v29 = vld [vmem:[#allocation7 + $0x70] sm:$0xff]  ;;  %1101 = vmatpush1.bf16.msra.mxu1 %v1100_v22  ;;  %v1120_v22 = vpack.c.bf16 %v810_v16, %v808_v14  ;;  %v1186_v23 = vpack.c.bf16 %v751_v18, %v749_v17  ;;  %v755_v30 = vld [vmem:[#allocation5 + $0x138] sm:$0xff]  ;;  %s1351_s4 = smov [#allocation8]  }
 0x2aa   :  { %v626_v42 = vmul.f32 2.0, %v75_v50  ;;  %v792_v28 = vld [vmem:[#allocation7 + $0x60] sm:$0xff]  ;;  %1103 = vmatprep.subr.bf16.mxu1 %v1102_v27  ;;  %v737_v50 = vld [vmem:[#allocation5 + $0xa8] sm:$0xff]  ;;  %v1122_v27 = vpack.c.bf16 %v815_v20, %v813_v19  ;;  %v762_v14 = vld [vmem:[#allocation5 + $0x170] sm:$0xff]  ;;  %s1072_s20 = sshll.u32 %s1351_s4, 4  ;;  %s1073_s20 = int_to_ptr.vmem [resolvable:$true] %s1072_s20 }
 0x2ab   :  { %v608_v37 = vsel %vm390_vm7, %v569_v33, %v607_v35  ;;  %v615_v40 = vsel %vm390_vm7, %v601_v32, %v614_v39  ;;  %v1168_v32 = vpack.c.bf16 %v730_v24, %v728_v21  ;;  %v797_v33 = vld [vmem:[#allocation7 + $0x88] sm:$0xff]  ;;  %v1104_v35 = vpack.c.bf16 %v794_v29, %v792_v28  ;;  %v796_v39 = vld [vmem:[#allocation7 + $0x80] sm:$0xff]  ;;  %v814_v28 = vld [vmem:[#allocation7 + $0x110] sm:$0xff]  ;;  %s1316_s21 = scalar_lea.vmem %s1073_s20, 512  ;;  %p1321_p11 = scmp.lt.s32.totalorder %s1073_s20, %s1073_s20 }
 0x2ac   :  { %v618_v38 = vsel %vm401_vm8, %v608_v37, 0.0  ;;  %v621_v41 = vsel %vm401_vm8, %v615_v40, 0.0  ;;  %v631_v43 = vrot.slane %v626_v42, %v1454_v13  ;;  %v732_v37 = vld [vmem:[#allocation5 + $0x80] sm:$0xff]  ;;  %v1106_v40 = vpack.c.bf16 %v799_v34, %v797_v33  ;;  %v739_v42 = vld [vmem:[#allocation5 + $0xb8] sm:$0xff]  ;;  %v753_v29 = vld [vmem:[#allocation5 + $0x128] sm:$0xff]  ;;  %p1317_p10 = scmp.ne.s32.totalorder %s1073_s20, %s1316_s21  ;;  %p1322_p12 = scmp.lt.s32.totalorder %s1316_s21, %s1316_s21 }
 0x2ad   :  { %619 = vadd.xlane.f32.xlu0 %v618_v38  ;;  %v734_v38 = vld [vmem:[#allocation5 + $0x90] sm:$0xff]  ;;  %1169 = vmatpush1.bf16.msra.mxu0 %v1168_v32  ;;  %v1174_v47 = vpack.c.bf16 %v739_v42, %v737_v50  ;;  %v1184_v21 = vpack.c.bf16 %v746_v12, %v744_v11  ;;  %v748_v24 = vld [vmem:[#allocation5 + $0x100] sm:$0xff]  ;;  %v817_v31 = vld [vmem:[#allocation7 + $0x128] sm:$0xff]  ;;  %v1124_v34 = vpack.c.bf16 %v814_v28, %v812_v26 }
 0x2ae   :  { %v1172_v45 = vpack.c.bf16 %v734_v38, %v732_v37  ;;  %1105 = vmatpush1.bf16.msra.mxu1 %v1104_v35  ;;  %1171 = vmatprep.subr.bf16.mxu0 %v1170_v36  ;;  %v819_v32 = vld [vmem:[#allocation7 + $0x138] sm:$0xff]  ;;  %v1188_v33 = vpack.c.bf16 %v750_v25, %v748_v24  ;;  %v1190_v35 = vpack.c.bf16 %v755_v30, %v753_v29  ;;  %v752_v36 = vld [vmem:[#allocation5 + $0x120] sm:$0xff]  ;;  %v754_v37 = vld [vmem:[#allocation5 + $0x130] sm:$0xff]  ;;  %p1323_p13 = por %p1322_p12, %p1321_p11 }
 0x2af   :  { %1107 = vmatprep.subr.bf16.mxu1 %v1106_v40  ;;  %v816_v38 = vld [vmem:[#allocation7 + $0x120] sm:$0xff]  ;;  %v818_v40 = vld [vmem:[#allocation7 + $0x130] sm:$0xff]  ;;  %v759_v50 = vld [vmem:[#allocation5 + $0x158] sm:$0xff] }
 0x2b0   :  { %v821_v42 = vld [vmem:[#allocation7 + $0x148] sm:$0xff]  ;;  %v760_v12 = vld [vmem:[#allocation5 + $0x160] sm:$0xff]  ;;  %v827_v17 = vld [vmem:[#allocation7 + $0x178] sm:$0xff]  ;;  %p1324_p0 = pnand %p1323_p13, %p1317_p10 }
 0x2b1   :  { %622 = vadd.xlane.f32.xlu0 %v621_v41  ;;  %v798_v41 = vld [vmem:[#allocation7 + $0x90] sm:$0xff]  ;;  %1173 = vmatpush1.bf16.msra.mxu0 %v1172_v45  ;;  %v1128_v45 = vpack.c.bf16 %v818_v40, %v816_v38  ;;  %v825_v16 = vld [vmem:[#allocation7 + $0x168] sm:$0xff]  ;;  %v824_v19 = vld [vmem:[#allocation7 + $0x160] sm:$0xff] }
 0x2b2   :  { %v1108_v46 = vpack.c.bf16 %v798_v41, %v796_v39  ;;  %1175 = vmatprep.subr.bf16.mxu0 %v1174_v47  ;;  %v1126_v39 = vpack.c.bf16 %v819_v32, %v817_v31  ;;  %v757_v41 = vld [vmem:[#allocation5 + $0x148] sm:$0xff]  ;;  %v756_v47 = vld [vmem:[#allocation5 + $0x140] sm:$0xff]  ;;  %v1134_v18 = vpack.c.bf16 %v827_v17, %v825_v16  ;;  %v826_v20 = vld [vmem:[#allocation7 + $0x170] sm:$0xff] }
 0x2b3   :  { %v1196_v53 = vpack.c.bf16 %v758_v48, %v756_v47  ;;  %v767_v24 = vld [vmem:[#allocation5 + $0x198] sm:$0xff]  ;;  %v764_v26 = vld [vmem:[#allocation5 + $0x180] sm:$0xff]  ;;  %v829_v29 = vld [vmem:[#allocation7 + $0x188] sm:$0xff] }
 0x2b4   :  { %1109 = vmatpush1.bf16.msra.mxu1 %v1108_v46  ;;  %v1194_v46 = vpack.c.bf16 %v759_v50, %v757_v41  ;;  %v831_v30 = vld [vmem:[#allocation7 + $0x198] sm:$0xff]  ;;  %v828_v32 = vld [vmem:[#allocation7 + $0x180] sm:$0xff]  ;;  %v833_v41 = vld [vmem:[#allocation7 + $0x1a8] sm:$0xff] }
 0x2b5   :  { %1177 = vmatpush1.bf16.msra.mxu0 %v1176_v58  ;;  %v1138_v31 = vpack.c.bf16 %v831_v30, %v829_v29  ;;  %v768_v38 = vld [vmem:[#allocation5 + $0x1a0] sm:$0xff]  ;;  %v835_v50 = vld [vmem:[#allocation7 + $0x1b8] sm:$0xff] }
 0x2b6   :  { %1179 = vmatprep.subr.bf16.mxu0 %v1178_v60  ;;  %v775_v47 = vld [vmem:[#allocation5 + $0x1d8] sm:$0xff]  ;;  %v772_v48 = vld [vmem:[#allocation5 + $0x1c0] sm:$0xff] }
 0x2b9   :  { %1181 = vmatpush1.bf16.msra.mxu0 %v1180_v6 }
 0x2ba   :  { %1183 = vmatprep.subr.bf16.mxu0 %v1182_v8  ;;  %v763_v8 = vld [vmem:[#allocation5 + $0x178] sm:$0xff] }
 0x2bd   :  { %1185 = vmatpush1.bf16.msra.mxu0 %v1184_v21 }
 0x2be   :  { %1187 = vmatprep.subr.bf16.mxu0 %v1186_v23  ;;  %v765_v23 = vld [vmem:[#allocation5 + $0x188] sm:$0xff] }
 0x2bf   :  { %v1202_v25 = vpack.c.bf16 %v767_v24, %v765_v23 }
 0x2c1   :  { %1189 = vmatpush1.bf16.msra.mxu0 %v1188_v33  ;;  %v830_v33 = vld [vmem:[#allocation7 + $0x190] sm:$0xff] }
 0x2c2   :  { %1191 = vmatprep.subr.bf16.mxu0 %v1190_v35  ;;  %v769_v35 = vld [vmem:[#allocation5 + $0x1a8] sm:$0xff] }
 0x2c7   :  { %633 = vbcast.lane.b32.xlu0 %v631_v43, 256  ;;  %v801_v43 = vld [vmem:[#allocation7 + $0xa8] sm:$0xff] }
 0x2c8   :  { %v1110_v52 = vpack.c.bf16 %v803_v44, %v801_v43  ;;  %v823_v43 = vld [vmem:[#allocation7 + $0x158] sm:$0xff]  ;;  %v1192_v44 = vpack.c.bf16 %v754_v37, %v752_v36 }
 0x2c9   :  { %v1130_v49 = vpack.c.bf16 %v823_v43, %v821_v42  ;;  %v771_v36 = vld [vmem:[#allocation5 + $0x1b8] sm:$0xff]  ;;  %v1142_v42 = vpack.c.bf16 %v835_v50, %v833_v41  ;;  %v832_v43 = vld [vmem:[#allocation7 + $0x1a0] sm:$0xff] }
 0x2ca   :  { %1111 = vmatprep.subr.bf16.mxu1 %v1110_v52  ;;  %v822_v52 = vld [vmem:[#allocation7 + $0x150] sm:$0xff]  ;;  %1193 = vmatpush1.bf16.msra.mxu0 %v1192_v44  ;;  %v1206_v37 = vpack.c.bf16 %v771_v36, %v769_v35 }
 0x2cb   :  { %1113 = vmatpush1.bf16.msra.mxu1 %v1112_v59  ;;  %1195 = vmatprep.subr.bf16.mxu0 %v1194_v46  ;;  %v1132_v54 = vpack.c.bf16 %v822_v52, %v820_v51  ;;  %v834_v44 = vld [vmem:[#allocation7 + $0x1b0] sm:$0xff] }
 0x2cc   :  { %1115 = vmatprep.subr.bf16.mxu1 %v1114_v0  ;;  %v1144_v46 = vpack.c.bf16 %v834_v44, %v832_v43 }
 0x2ce   :  { %1197 = vmatpush1.bf16.msra.mxu0 %v1196_v53  ;;  %v837_v53 = vld [vmem:[#allocation7 + $0x1c8] sm:$0xff] }
 0x2cf   :  { %1117 = vmatpush1.bf16.msra.mxu1 %v1116_v7  ;;  %v761_v7 = vld [vmem:[#allocation5 + $0x168] sm:$0xff] }
 0x2d0   :  { %1119 = vmatprep.subr.bf16.mxu1 %v1118_v15  ;;  %v1198_v11 = vpack.c.bf16 %v763_v8, %v761_v7  ;;  %v1200_v15 = vpack.c.bf16 %v762_v14, %v760_v12  ;;  %v1246_v8 = vld [vmem:[#allocation2] sm:$0xff]  ;;  %v1247_v12 = vld [vmem:[#allocation2 + $0x8] sm:$0xff] }
 0x2d2   :  { %1199 = vmatprep.subr.bf16.mxu0 %v1198_v11 }
 0x2d3   :  { %1121 = vmatpush1.bf16.msra.mxu1 %v1120_v22  ;;  %1201 = vmatpush1.bf16.msra.mxu0 %v1200_v15  ;;  %v1136_v22 = vpack.c.bf16 %v826_v20, %v824_v19  ;;  %v1248_v20 = vld [vmem:[#allocation2 + $0x10] sm:$0xff] }
 0x2d4   :  { %1123 = vmatprep.subr.bf16.mxu1 %v1122_v27  ;;  %v766_v27 = vld [vmem:[#allocation5 + $0x190] sm:$0xff]  ;;  %1203 = vmatprep.subr.bf16.mxu0 %v1202_v25 }
 0x2d5   :  { %v1204_v28 = vpack.c.bf16 %v766_v27, %v764_v26 }
 0x2d7   :  { %1125 = vmatpush1.bf16.msra.mxu1 %v1124_v34  ;;  %1205 = vmatpush1.bf16.msra.mxu0 %v1204_v28  ;;  %v1140_v34 = vpack.c.bf16 %v830_v33, %v828_v32 }
 0x2d8   :  { %1127 = vmatprep.subr.bf16.mxu1 %v1126_v39  ;;  %v770_v39 = vld [vmem:[#allocation5 + $0x1b0] sm:$0xff]  ;;  %1207 = vmatprep.subr.bf16.mxu0 %v1206_v37 }
 0x2d9   :  { %v1208_v40 = vpack.c.bf16 %v770_v39, %v768_v38 }
 0x2db   :  { %1129 = vmatpush1.bf16.msra.mxu1 %v1128_v45  ;;  %v773_v45 = vld [vmem:[#allocation5 + $0x1c8] sm:$0xff]  ;;  %1209 = vmatpush1.bf16.msra.mxu0 %v1208_v40 }
 0x2dc   :  { %1131 = vmatprep.subr.bf16.mxu1 %v1130_v49  ;;  %v774_v49 = vld [vmem:[#allocation5 + $0x1d0] sm:$0xff]  ;;  %v1210_v51 = vpack.c.bf16 %v775_v47, %v773_v45 }
 0x2dd   :  { %v1212_v52 = vpack.c.bf16 %v774_v49, %v772_v48 }
 0x2de   :  { %1211 = vmatprep.subr.bf16.mxu0 %v1210_v51 }
 0x2df   :  { %1133 = vmatpush1.bf16.msra.mxu1 %v1132_v54  ;;  %v839_v54 = vld [vmem:[#allocation7 + $0x1d8] sm:$0xff]  ;;  %1213 = vmatpush1.bf16.msra.mxu0 %v1212_v52 }
 0x2e0   :  { %1135 = vmatprep.subr.bf16.mxu1 %v1134_v18 }
 0x2e3   :  { %1137 = vmatpush1.bf16.msra.mxu1 %v1136_v22  ;;  %v1249_v22 = vld [vmem:[#allocation2 + $0x18] sm:$0xff] }
 0x2e4   :  { %1139 = vmatprep.subr.bf16.mxu1 %v1138_v31 }
 0x2e7   :  { %1141 = vmatpush1.bf16.msra.mxu1 %v1140_v34 }
 0x2e8   :  { %1143 = vmatprep.subr.bf16.mxu1 %v1142_v42 }
 0x2eb   :  { %1145 = vmatpush1.bf16.msra.mxu1 %v1144_v46 }
 0x31a   :  { %v404_v55 = vpop.xlane.xlu0 %403  ;;  %v407_v58 = vpop.xlane.xlu1 %406 }
 0x33a   :  { %v620_v56 = vpop.xlane.xlu0 %619 }
 0x33b   :  { %v624_v59 = vadd.f32 %v620_v56, %v404_v55  ;;  %v836_v55 = vld [vmem:[#allocation7 + $0x1c0] sm:$0xff]  ;;  %v1146_v56 = vpack.c.bf16 %v839_v54, %v837_v53 }
 0x33d   :  { %1147 = vmatprep.subr.bf16.mxu1 %v1146_v56 }
 0x33e   :  { %v623_v57 = vpop.xlane.xlu0 %622 }
 0x33f   :  { %v625_v60 = vadd.f32 %v623_v57, %v407_v58  ;;  %v838_v57 = vld [vmem:[#allocation7 + $0x1d0] sm:$0xff]  ;;  %v777_v58 = vld [vmem:[#allocation5 + $0x1e8] sm:$0xff] }
 0x342   :  { %v634_v61 = vpop.permute.xlu0 %633 }
 0x343   :  { %v636_v62 = vadd.f32 %v634_v61, %v624_v59  ;;  %v637_v63 = vadd.f32 %v634_v61, %v625_v60  ;;  %v779_v59 = vld [vmem:[#allocation5 + $0x1f8] sm:$0xff]  ;;  %v1148_v60 = vpack.c.bf16 %v838_v57, %v836_v55 }
 0x344   :  { %v1214_v61 = vpack.c.bf16 %v779_v59, %v777_v58 }
 0x345   :  { %v1086_v0 = vmul.f32 -1.442695, %v636_v62  ;;  %v1087_v1 = vmul.f32 -1.442695, %v637_v63  ;;  %v776_v62 = vld [vmem:[#allocation5 + $0x1e0] sm:$0xff]  ;;  %v778_v63 = vld [vmem:[#allocation5 + $0x1f0] sm:$0xff]  ;;  %1149 = vmatpush1.bf16.msra.mxu1 %v1148_v60 }
 0x346   :  { %1215 = vmatprep.subr.bf16.mxu0 %v1214_v61 }
 0x347   :  { %1230 = vpow2.f32 %v1086_v0  ;;  %v841_v0 = vld [vmem:[#allocation7 + $0x1e8] sm:$0xff] }
 0x348   :  { %1232 = vpow2.f32 %v1087_v1  ;;  %v1216_v1 = vpack.c.bf16 %v778_v63, %v776_v62 }
 0x34a   :  { %1217 = vmatpush1.bf16.msra.mxu0 %v1216_v1 }
 0x351   :  { %v1231_v2 = vpop.eup %1230 }
 0x352   :  { %v1233_v3 = vpop.eup %1232  ;;  %v644_v4 = vadd.f32 1.0, %v1231_v2  ;;  %v843_v2 = vld [vmem:[#allocation7 + $0x1f8] sm:$0xff] }
 0x353   :  { %v645_v5 = vadd.f32 1.0, %v1233_v3  ;;  %v840_v3 = vld [vmem:[#allocation7 + $0x1e0] sm:$0xff] }
 0x354   :  { %1234 = vrcp.f32 %v644_v4  ;;  %v842_v4 = vld [vmem:[#allocation7 + $0x1f0] sm:$0xff] }
 0x355   :  { %1236 = vrcp.f32 %v645_v5  ;;  %v1150_v5 = vpack.c.bf16 %v843_v2, %v841_v0 }
 0x357   :  { %1151 = vmatprep.subr.bf16.mxu1 %v1150_v5 }
 0x35e   :  { %v1235_v6 = vpop.eup %1234 }
 0x35f   :  { %652 = vperm.xlu1 %1228, %v1235_v6   ;;  %v1237_v21 = vpop.eup %1236  ;;  %v1152_v6 = vpack.c.bf16 %v842_v4, %v840_v3 }
 0x361   :  { %1153 = vmatpush1.bf16.msra.mxu1 %v1152_v6 }
 0x363   :  { %657 = vperm.xlu1 %1228, %v1237_v21  }
 0x3de   :  { %v653_v7 = vpop.permute.xlu1 %652 }
 0x3df   :  { %v1588_v11 = vmul.f32 %v1246_v8, %v653_v7  ;;  %v1590_v14 = vmul.f32 %v1247_v12, %v653_v7 }
 0x3e1   :  { %v664_v15 = vrot.slane %v1588_v11, 4  ;;  %v670_v16 = vrot.slane %v1590_v14, 4 }
 0x3e2   :  { %v658_v17 = vpop.permute.xlu1 %657 }
 0x3e3   :  { %v665_v18 = vmax.f32 %v1588_v11, %v664_v15  ;;  %v689_v19 = vadd.f32 %v664_v15, %v1588_v11  ;;  %v1596_v21 = vmul.f32 %v1248_v20, %v658_v17  ;;  %v1598_v23 = vmul.f32 %v1249_v22, %v658_v17 }
 0x3e4   :  { %v671_v24 = vmax.f32 %v1590_v14, %v670_v16  ;;  %v695_v25 = vadd.f32 %v670_v16, %v1590_v14 }
 0x3e5   :  { %v676_v26 = vrot.slane %v1596_v21, 4  ;;  %v682_v27 = vrot.slane %v1598_v23, 4  ;;  %v666_v28 = vrot.slane %v665_v18, 2  ;;  %v690_v29 = vrot.slane %v689_v19, 2 }
 0x3e6   :  { %v672_v30 = vrot.slane %v671_v24, 2  ;;  %v696_v31 = vrot.slane %v695_v25, 2 }
 0x3e7   :  { %v677_v32 = vmax.f32 %v1596_v21, %v676_v26  ;;  %v701_v33 = vadd.f32 %v676_v26, %v1596_v21  ;;  %v707_v34 = vadd.f32 %v682_v27, %v1598_v23  ;;  %v683_v35 = vmax.f32 %v1598_v23, %v682_v27 }
 0x3e8   :  { %v673_v36 = vmax.f32 %v671_v24, %v672_v30  ;;  %v667_v37 = vmax.f32 %v665_v18, %v666_v28  ;;  %v697_v38 = vadd.f32 %v696_v31, %v695_v25  ;;  %v691_v39 = vadd.f32 %v690_v29, %v689_v19 }
 0x3e9   :  { %v702_v40 = vrot.slane %v701_v33, 2  ;;  %v684_v41 = vrot.slane %v683_v35, 2  ;;  %v678_v50 = vrot.slane %v677_v32, 2  ;;  %v708_v42 = vrot.slane %v707_v34, 2 }
 0x3ea   :  { %v674_v43 = vrot.slane %v673_v36, 1  ;;  %v668_v44 = vrot.slane %v667_v37, 1  ;;  %v698_v45 = vrot.slane %v697_v38, 1  ;;  %v692_v46 = vrot.slane %v691_v39, 1 }
 0x3eb   :  { %v685_v47 = vmax.f32 %v683_v35, %v684_v41  ;;  %v679_v48 = vmax.f32 %v677_v32, %v678_v50  ;;  %v709_v49 = vadd.f32 %v708_v42, %v707_v34  ;;  %v703_v51 = vadd.f32 %v702_v40, %v701_v33 }
 0x3ec   :  { %v699_v52 = vadd.f32 %v698_v45, %v697_v38  ;;  %v693_v53 = vadd.f32 %v692_v46, %v691_v39  ;;  %v675_v58 = vmax.f32 %v673_v36, %v674_v43  ;;  %v669_v59 = vmax.f32 %v667_v37, %v668_v44 }
 0x3ed   :  { %v686_v54 = vrot.slane %v685_v47, 1  ;;  %v680_v55 = vrot.slane %v679_v48, 1  ;;  %v710_v56 = vrot.slane %v709_v49, 1  ;;  %v704_v57 = vrot.slane %v703_v51, 1 }
 0x3ee   :  { %v713_v0 = vmul.f32 0.125, %v699_v52  ;;  %v712_v1 = vmul.f32 0.125, %v693_v53  ;;  %v1350_v27 = vmov 1966171168  }
 0x3ef   :  { %v687_v60 = vmax.f32 %v685_v47, %v686_v54  ;;  %v681_v61 = vmax.f32 %v679_v48, %v680_v55  ;;  %v711_v62 = vadd.f32 %v710_v56, %v709_v49  ;;  %v705_v63 = vadd.f32 %v704_v57, %v703_v51 }
 0x3f0   :  { %v1018_v28 = vunpack.c.l.s4 %v1350_v27 }
 0x3f1   :  { %v928_v2 = vsel %vm145_vm0, %v687_v60, %v675_v58  ;;  %v927_v3 = vsel %vm145_vm0, %v681_v61, %v669_v59  ;;  %v715_v4 = vmul.f32 0.125, %v711_v62  ;;  %v714_v5 = vmul.f32 0.125, %v705_v63 }
 0x3f2   :  { %995 = vmatprep.mubr.f32.mxu0 %v928_v2  ;;  %v1019_v29 = vunpack.c.0.s8 %v1018_v28 }
 0x3f3   :  { %996 = vmatmul.mubr.f32.vlgmr.msra.gmra.mrb[0].mxu0 %v927_v3  ;;  %v849_v6 = vsel %vm145_vm0, %v715_v4, %v713_v0  ;;  %v848_v7 = vsel %vm145_vm0, %v714_v5, %v712_v1 }
 0x3f4   :  { %916 = vmatprep.mubr.f32.mxu1 %v849_v6  ;;  %v1022_v31 = vsub.s32 %v1019_v29, %v1444_v9 }
 0x3f5   :  { %917 = vmatmul.mubr.f32.vlgmr.msra.gmra.mrb[0].mxu1 %v848_v7 }
 0x4c6   :  { %v997_v8 = vpop.f32.mrb[0].mxu0 }
 0x4c7   :  { %v999_v12 = vpop.f32.mrb[1].mxu0 }
 0x4c8   :  { %v918_v15 = vpop.f32.mrb[0].mxu1 }
 0x4c9   :  { %v998_v16 = vadd.f32 %v997_v8, %v918_v15  ;;  %v920_v17 = vpop.f32.mrb[1].mxu1 }
 0x4ca   :  { %v1000_v18 = vadd.f32 %v999_v12, %v920_v17 }
 0x4cb   :  { %v1088_v19 = vmul.f32 -1.442695, %v998_v16 }
 0x4cc   :  { %v1089_v20 = vmul.f32 -1.442695, %v1000_v18 }
 0x4cd   :  { %1238 = vpow2.f32 %v1088_v19 }
 0x4ce   :  { %1240 = vpow2.f32 %v1089_v20 }
 0x4d7   :  { %v1239_v22 = vpop.eup %1238 }
 0x4d8   :  { %v1241_v24 = vpop.eup %1240  ;;  %v1008_v25 = vadd.f32 1.0, %v1239_v22 }
 0x4d9   :  { %v1009_v26 = vadd.f32 1.0, %v1241_v24 }
 0x4da   :  { %1242 = vrcp.f32 %v1008_v25 }
 0x4db   :  { %1244 = vrcp.f32 %v1009_v26 }
 0x4e4   :  { %v1243_v30 = vpop.eup %1242 }
 0x4e5   :  { %v1245_v32 = vpop.eup %1244 }
 0x4e6   :  { %v1016_v33 = vcombine.low %v1243_v30, %v1245_v32 }
 0x4e8   :  { %v1023_v34 = vrot.slane %v1016_v33, %v1022_v31 }
 0x4ea   :  { %v1024_v35 = vcombine.high %v1023_v34, %v1023_v34  ;;  %v1031_v36 = vrot.slane %v1023_v34, %v1022_v31 }
 0x4ec   :  { %v1038_v37 = vrot.slane %v1024_v35, %v1022_v31  ;;  %v1042_v38 = vrot.slane %v1031_v36, %v1454_v13  ;;  %v1046_v39 = vrot.slane %v1031_v36, %v1447_v10 }
 0x4ee   :  { %v1050_v40 = vrot.slane %v1038_v37, %v1454_v13  ;;  %v1054_v41 = vrot.slane %v1038_v37, %v1447_v10  ;;  %v1059_v50 = vmul.f32 %v1042_v38, %v1588_v11  ;;  %v1060_v9 = vmul.f32 %v1046_v39, %v1590_v14 }
 0x4f0   :  { %v1061_v42 = vmul.f32 %v1050_v40, %v1596_v21  ;;  %v1062_v43 = vmul.f32 %v1054_v41, %v1598_v23  ;;  %1063 = vst [vmem:[#allocation8] sm:$0xff] %v1059_v50  ;;  %1064 = vst [vmem:[#allocation8 + $0x8] sm:$0xff] %v1060_v9 }
 0x4f2   :  { %1065 = vst [vmem:[#allocation8 + $0x10] sm:$0xff] %v1061_v42  ;;  %1066 = vst [vmem:[#allocation8 + $0x18] sm:$0xff] %v1062_v43 }
 0x4f3   :  { %1327 = shalt.err (!%p1324_p0)
}
 0x4f4   :  { %s1328_s24 = scalar_lea.hbm %s1643_s7, 512 }
 0x4f5   :  { %p1329_p1 = scmp.ne.s32.totalorder %s1643_s7, %s1328_s24  ;;  %p1332_p2 = scmp.lt.u32.totalorder %s1328_s24, %s1643_s7 }
 0x4f7   :  { %p1334_p3 = pnand %p1332_p2, %p1329_p1 }
 0x4f9   :  { %1337 = shalt.err (!%p1334_p3)
}
 0x4fa   :  { %1078 = dma.vmem_to_hbm [thread:$0]  %s1073_s20, 512, %s1643_s7, [#allocation4], %s1346_s13, %s1346_s13, %s1347_s14  }
 0x4fb   :  { %1342 = dma.done.wait [#allocation4], 512  }
 0x4fc   :  { %1343 = vsyncadd [#allocation4], 4294966784 }
 0x4fd   :  { %1082 = vsyncpa [#allocation3], 1 }
 0x4fe   :  { %1083 = vsyncpa [#allocation6], 1 }
 0x4ff   :  { %1084 = vsyncpa [#allocation4], 1 }

</bundles_post_ra>
